<compile_context>
chip_gen: v5e
topology: v5e:2x2
jax: 0.10.0
libtpu: 0.0.40
codegen_flags: <defaults>
</compile_context>

<pallas_src>
from functools import partial

import jax
import jax.numpy as jnp
from jax import lax
from jax.experimental import pallas as pl
from jax.experimental.pallas import tpu as pltpu

_LN_EPS = 1e-5  # nn.LayerNorm default


# --------------------------- kernels ---------------------------------------
def patch_embed_kernel(p_ref, w_ref, b_ref, o_ref):
    # p_ref: (tm, K)  w_ref: (K, E)  b_ref: (1, E)  o_ref: (tm, E)
    y = jnp.dot(p_ref[...], w_ref[...], preferred_element_type=jnp.float32)
    o_ref[...] = (y + b_ref[...]).astype(o_ref.dtype)


def patch_embed_ln_kernel(p_ref, w_ref, b_ref, g_ref, beta_ref, o_ref, *, eps):
    # Same as above with a fused LayerNorm epilogue over the embed (lane) axis.
    y = jnp.dot(p_ref[...], w_ref[...], preferred_element_type=jnp.float32)
    y = y + b_ref[...]
    mu = jnp.mean(y, axis=-1, keepdims=True)
    var = jnp.mean((y - mu) ** 2, axis=-1, keepdims=True)
    y = (y - mu) * lax.rsqrt(var + eps) * g_ref[...] + beta_ref[...]
    o_ref[...] = y.astype(o_ref.dtype)


# --------------------------- wrapper ----------------------------------------
def _round_up(x, m):
    return (x + m - 1) // m * m


def _pick_token_tile(m):
    # Largest sublane-friendly tile that divides M exactly; otherwise fall back
    # to a padded tile (big if M is big, else M rounded up to a multiple of 8).
    for t in (512, 256, 128, 64, 32, 16, 8):
        if m % t == 0:
            return t
    return 512 if m >= 512 else _round_up(m, 8)


def patch_embed_forward(x, weight, bias, *, patch_size, ln=None, eps=_LN_EPS,
                        compute_dtype=None, token_tile=None):
    """PatchEmbed forward.

    x:      (B, Cin, H, W)
    weight: (E, Cin, p, p)   (PyTorch Conv2d layout)
    bias:   (E,)
    ln:     optional (gamma, beta) each (E,) -> fused LayerNorm (norm_layer)
    Returns (B, num_patches, E)   [== proj(x).flatten(2).transpose(1, 2)]
    """
    p = patch_size
    B, Cin, H, W = x.shape
    E = weight.shape[0]
    Gh, Gw = H // p, W // p
    P = Gh * Gw
    K = Cin * p * p
    M = B * P

    # im2col: per-patch pixel order (c, kh, kw) matches Conv2d weight flatten.
    patches = x.reshape(B, Cin, Gh, p, Gw, p)
    patches = patches.transpose(0, 2, 4, 1, 3, 5).reshape(M, K)
    w2d = weight.reshape(E, K).T                      # (K, E): y = patches @ w2d
    b2d = bias.reshape(1, E).astype(jnp.float32)

    if compute_dtype is not None:                     # e.g. bf16 MXU path
        patches = patches.astype(compute_dtype)
        w2d = w2d.astype(compute_dtype)

    tm = token_tile or _pick_token_tile(M)
    m_pad = _round_up(M, tm)
    if m_pad != M:
        patches = jnp.pad(patches, ((0, m_pad - M), (0, 0)))
    grid = (m_pad // tm,)

    in_specs = [
        pl.BlockSpec((tm, K), lambda i: (i, 0)),      # token tile of patches
        pl.BlockSpec((K, E), lambda i: (0, 0)),       # projection weight (resident)
        pl.BlockSpec((1, E), lambda i: (0, 0)),       # projection bias (resident)
    ]
    args = [patches, w2d, b2d]

    if ln is None:
        kernel = patch_embed_kernel
        transcendentals = 0
    else:
        gamma, beta = ln
        kernel = partial(patch_embed_ln_kernel, eps=eps)
        in_specs += [pl.BlockSpec((1, E), lambda i: (0, 0)),
                     pl.BlockSpec((1, E), lambda i: (0, 0))]
        args += [gamma.reshape(1, E).astype(jnp.float32),
                 beta.reshape(1, E).astype(jnp.float32)]
        transcendentals = m_pad                       # one rsqrt per token

    itemsize = patches.dtype.itemsize
    cost = pl.CostEstimate(
        flops=int(2 * m_pad * K * E),
        transcendentals=int(transcendentals),
        bytes_accessed=int(patches.size * itemsize + w2d.size * itemsize
                           + b2d.size * 4 + m_pad * E * x.dtype.itemsize),
    )

    out = pl.pallas_call(
        kernel,
        out_shape=jax.ShapeDtypeStruct((m_pad, E), x.dtype),
        grid=grid,
        in_specs=in_specs,
        out_specs=pl.BlockSpec((tm, E), lambda i: (i, 0)),
        compiler_params=pltpu.CompilerParams(
            dimension_semantics=("parallel",)),
        cost_estimate=cost,
    )(*args)

    return out[:M].reshape(B, P, E)


# ---------------- pure-JAX reference (for correctness check) ----------------
def patch_embed_ref(x, weight, bias, patch_size, ln=None, eps=_LN_EPS):
    p = patch_size
    y = lax.conv_general_dilated(
        x, weight, window_strides=(p, p), padding="VALID",
        dimension_numbers=("NCHW", "OIHW", "NCHW"))
    y = y + bias[None, :, None, None]
    B, E, Gh, Gw = y.shape
    y = y.reshape(B, E, Gh * Gw).transpose(0, 2, 1)   # flatten(2).transpose(1,2)
    if ln is not None:
        gamma, beta = ln
        mu = jnp.mean(y, axis=-1, keepdims=True)
        var = jnp.mean((y - mu) ** 2, axis=-1, keepdims=True)
        y = (y - mu) / jnp.sqrt(var + eps) * gamma + beta
    return y


if __name__ == "__main__":
    # Small shapes consistent with the module: 32x32 RGB image, 16x16 patches,
    # embed_dim=128 -> 4 tokens/image of width 128 (lane-dense output).
    B, Cin, H, W = 2, 3, 32, 32
    patch = 16
    E = 128

    key = jax.random.PRNGKey(0)
    k1, k2, k3, k4, k5 = jax.random.split(key, 5)
    x = jax.random.normal(k1, (B, Cin, H, W), jnp.float32)
    w = 0.02 * jax.random.normal(k2, (E, Cin, patch, patch), jnp.float32)
    b = 0.01 * jax.random.normal(k3, (E,), jnp.float32)

    # ---- default path: norm_layer=None (Identity) ----
    out = patch_embed_forward(x, w, b, patch_size=patch)
    out = jax.block_until_ready(out)
    ref = patch_embed_ref(x, w, b, patch)
    assert out.shape == (B, (H // patch) * (W // patch), E)
    assert jnp.allclose(out, ref, rtol=1e-4, atol=1e-4), (
        f"identity path max abs err {jnp.max(jnp.abs(out - ref))}")

    # ---- norm_layer=LayerNorm path (fused in kernel) ----
    gamma = 1.0 + 0.05 * jax.random.normal(k4, (E,), jnp.float32)
    beta = 0.01 * jax.random.normal(k5, (E,), jnp.float32)
    out_ln = patch_embed_forward(x, w, b, patch_size=patch, ln=(gamma, beta))
    out_ln = jax.block_until_ready(out_ln)
    ref_ln = patch_embed_ref(x, w, b, patch, ln=(gamma, beta))
    assert jnp.allclose(out_ln, ref_ln, rtol=1e-4, atol=1e-4), (
        f"layernorm path max abs err {jnp.max(jnp.abs(out_ln - ref_ln))}")

    # ---- bf16 compute path (f32 accumulation), looser tolerance ----
    out_bf16 = patch_embed_forward(x, w, b, patch_size=patch,
                                   compute_dtype=jnp.bfloat16)
    out_bf16 = jax.block_until_ready(out_bf16)
    assert jnp.allclose(out_bf16, ref, rtol=5e-2, atol=5e-2), (
        f"bf16 path max abs err {jnp.max(jnp.abs(out_bf16 - ref))}")

    print("KERNEL_OK")
</pallas_src>

<mosaic_0001>
module attributes {stable_mosaic.version = 11 : i64} {
  func.func @patch_embed_kernel(%arg0: i32, %arg1: memref<8x768xf32, #tpu.memory_space<vmem>>, %arg2: memref<768x128xf32, #tpu.memory_space<vmem>>, %arg3: memref<1x128xf32, #tpu.memory_space<vmem>>, %arg4: memref<8x128xf32, #tpu.memory_space<vmem>>) attributes {dimension_semantics = [#tpu.dimension_semantics<parallel>], iteration_bounds = array<i64: 1>, scalar_prefetch = 0 : i64, scratch_operands = 0 : i64, tpu.core_type = #tpu.core_type<tc>, window_params = [{transform_indices = @transform_0, window_bounds = array<i64: 8, 768>}, {pipeline_mode = #tpu.pipeline_mode<synchronous>, transform_indices = @transform_1, window_bounds = array<i64: 768, 128>}, {pipeline_mode = #tpu.pipeline_mode<synchronous>, transform_indices = @transform_2, window_bounds = array<i64: 1, 128>}, {transform_indices = @transform_3, window_bounds = array<i64: 8, 128>}]} {
    %c0 = arith.constant 0 : index
    %c0_0 = arith.constant 0 : index
    %0 = vector.load %arg1[%c0, %c0_0] : memref<8x768xf32, #tpu.memory_space<vmem>>, vector<8x768xf32>
    %c0_1 = arith.constant 0 : index
    %c0_2 = arith.constant 0 : index
    %1 = vector.load %arg2[%c0_1, %c0_2] : memref<768x128xf32, #tpu.memory_space<vmem>>, vector<768x128xf32>
    %cst = arith.constant dense<0.000000e+00> : vector<8x128xf32>
    %2 = tpu.matmul %0, %1, %cst {dimension_numbers = #tpu.dot_dimension_numbers<[1], [0], [0], [1], [0, 0, 1, 1], [], []>} : vector<8x768xf32>, vector<768x128xf32>, vector<8x128xf32> -> vector<8x128xf32>
    %c0_3 = arith.constant 0 : index
    %c0_4 = arith.constant 0 : index
    %3 = vector.load %arg3[%c0_3, %c0_4] : memref<1x128xf32, #tpu.memory_space<vmem>>, vector<1x128xf32>
    %4 = vector.broadcast %3 : vector<1x128xf32> to vector<8x128xf32>
    %5 = arith.addf %2, %4 : vector<8x128xf32>
    %c0_5 = arith.constant 0 : index
    %c0_6 = arith.constant 0 : index
    %6 = vector.load %arg4[%c0_5, %c0_6] : memref<8x128xf32, #tpu.memory_space<vmem>>, vector<8x128xf32>
    tpu.vector_store %arg4[%c0_5, %c0_6], %5 {strides = array<i32>} : memref<8x128xf32, #tpu.memory_space<vmem>>, vector<8x128xf32>,
    return
  }
  func.func @transform_0(%arg0: i32) -> (i32, i32) {
    %c0_i32 = arith.constant 0 : i32
    %c0_i32_0 = arith.constant 0 : i32
    return %arg0, %c0_i32 : i32, i32
  }
  func.func @transform_1(%arg0: i32) -> (i32, i32) {
    %c0_i32 = arith.constant 0 : i32
    %c0_i32_0 = arith.constant 0 : i32
    %c0_i32_1 = arith.constant 0 : i32
    return %c0_i32, %c0_i32_0 : i32, i32
  }
  func.func @transform_2(%arg0: i32) -> (i32, i32) {
    %c0_i32 = arith.constant 0 : i32
    %c0_i32_0 = arith.constant 0 : i32
    %c0_i32_1 = arith.constant 0 : i32
    return %c0_i32, %c0_i32_0 : i32, i32
  }
  func.func @transform_3(%arg0: i32) -> (i32, i32) {
    %c0_i32 = arith.constant 0 : i32
    %c0_i32_0 = arith.constant 0 : i32
    return %arg0, %c0_i32 : i32, i32
  }
}

</mosaic_0001>

<bundles_post_ra>
// kernel: tpu_custom_call.1
= control target key start
LH: loop header
LB: loop body
LE: loop exit
PB: predicated region body
PF: predicated region fallthrough
CT: control target
= control target key end

     0   :  { %8 = vsyncpa [#allocation3], 0  ;;  %s411_s0 = inlined_call_operand.hbm [shape: f32[8,768], index: 0, kind: input, shape index: {}]   ;;  %s412_s1 = inlined_call_operand.hbm [shape: f32[768,128], index: 1, kind: input, shape index: {}]   ;;  %s413_s2 = inlined_call_operand.vmem [shape: f32[1,128], index: 2, kind: input, shape index: {}]   ;;  %s414_s3 = inlined_call_operand.hbm [shape: f32[8,128], index: 3, kind: output, shape index: {}]  }
   0x1   :  { %9 = vsyncpa [#allocation6], 0 }
   0x2   :  { %10 = vsyncpa [#allocation4], 0  ;;  %s16_s14 = sshll.u32 %s411_s0, 4  ;;  %s374_s15 = smov [#allocation2]   ;;  %s17_s14 = int_to_ptr.hbm [resolvable:$true] %s16_s14 }
   0x3   :  { %s18_s16 = sshll.u32 %s374_s15, 4  ;;  %s26_s19 = sshll.u32 %s412_s1, 4  ;;  %s19_s16 = int_to_ptr.vmem [resolvable:$true] %s18_s16  ;;  %s27_s19 = int_to_ptr.hbm [resolvable:$true] %s26_s19 }
   0x4   :  { %21 = dma.hbm_to_vmem [thread:$0]  %s17_s14, 768, %s19_s16, [#allocation3]  }
   0x5   :  { %s375_s20 = smov [#allocation5]   ;;  %s376_s22 = smov 128  }
   0x6   :  { %s28_s21 = sshll.u32 %s375_s20, 4  ;;  %s377_s23 = smov 8   ;;  %s29_s21 = int_to_ptr.vmem [resolvable:$true] %s28_s21 }
   0x7   :  { %34 = dma.hbm_to_vmem [thread:$0]  %s27_s19, 12288, %s29_s21, [#allocation6], %s376_s22, %s376_s22, %s377_s23  }
   0x8   :  { %368 = dma.done.wait [#allocation3], 768  }
   0x9   :  { %369 = vsyncadd [#allocation3], 4294966528 }
   0xa   :  { %370 = dma.done.wait [#allocation6], 12288  }
   0xb   :  { %371 = vsyncadd [#allocation6], 4294955008  ;;  %v66_v0 = vld [vmem:[#allocation5 + $0x78] sm:$0xff]  ;;  %v65_v1 = vld [vmem:[#allocation5 + $0x70] sm:$0xff]  ;;  %s378_s24 = smov [#allocation7]   ;;  %s279_s28 = sshll.u32 %s414_s3, 4  ;;  %s280_s28 = int_to_ptr.hbm [resolvable:$true] %s279_s28 }
   0xc   :  { %v82_v2 = vld [vmem:[#allocation5 + $0xf8] sm:$0xff]  ;;  %151 = vmatpush.msra.mxu0 %v66_v0  ;;  %v81_v3 = vld [vmem:[#allocation5 + $0xf0] sm:$0xff]  ;;  %v64_v4 = vld [vmem:[#allocation5 + $0x68] sm:$0xff]  ;;  %s277_s25 = sshll.u32 %s378_s24, 4  ;;  %s278_s25 = int_to_ptr.vmem [resolvable:$true] %s277_s25 }
   0xd   :  { %171 = vmatpush.msra.mxu1 %v82_v2  ;;  %v80_v5 = vld [vmem:[#allocation5 + $0xe8] sm:$0xff]  ;;  %v63_v6 = vld [vmem:[#allocation5 + $0x60] sm:$0xff]  ;;  %v62_v8 = vld [vmem:[#allocation5 + $0x58] sm:$0xff] }
   0xe   :  { %152 = vmatpush.msra.mxu0 %v65_v1  ;;  %v79_v7 = vld [vmem:[#allocation5 + $0xe0] sm:$0xff]  ;;  %v78_v9 = vld [vmem:[#allocation5 + $0xd8] sm:$0xff]  ;;  %v61_v10 = vld [vmem:[#allocation5 + $0x50] sm:$0xff] }
   0xf   :  { %172 = vmatpush.msra.mxu1 %v81_v3  ;;  %v98_v11 = vld [vmem:[#allocation5 + $0x178] sm:$0xff]  ;;  %v77_v12 = vld [vmem:[#allocation5 + $0xd0] sm:$0xff]  ;;  %v96_v15 = vld [vmem:[#allocation5 + $0x168] sm:$0xff] }
  0x10   :  { %153 = vmatpush.msra.mxu0 %v64_v4  ;;  %191 = vmatpush.msra.mxu2 %v98_v11  ;;  %v97_v13 = vld [vmem:[#allocation5 + $0x170] sm:$0xff]  ;;  %v114_v14 = vld [vmem:[#allocation5 + $0x1f8] sm:$0xff]  ;;  %v60_v17 = vld [vmem:[#allocation5 + $0x48] sm:$0xff] }
  0x11   :  { %173 = vmatpush.msra.mxu1 %v80_v5  ;;  %v113_v16 = vld [vmem:[#allocation5 + $0x1f0] sm:$0xff]  ;;  %v76_v18 = vld [vmem:[#allocation5 + $0xc8] sm:$0xff]  ;;  %211 = vmatpush.msra.mxu3 %v114_v14  ;;  %v95_v19 = vld [vmem:[#allocation5 + $0x160] sm:$0xff] }
  0x12   :  { %154 = vmatpush.msra.mxu0 %v63_v6  ;;  %192 = vmatpush.msra.mxu2 %v97_v13  ;;  %v112_v20 = vld [vmem:[#allocation5 + $0x1e8] sm:$0xff]  ;;  %v59_v21 = vld [vmem:[#allocation5 + $0x40] sm:$0xff]  ;;  %v94_v23 = vld [vmem:[#allocation5 + $0x158] sm:$0xff] }
  0x13   :  { %174 = vmatpush.msra.mxu1 %v79_v7  ;;  %v75_v22 = vld [vmem:[#allocation5 + $0xc0] sm:$0xff]  ;;  %212 = vmatpush.msra.mxu3 %v113_v16  ;;  %v58_v25 = vld [vmem:[#allocation5 + $0x38] sm:$0xff]  ;;  %v93_v27 = vld [vmem:[#allocation5 + $0x150] sm:$0xff] }
  0x14   :  { %155 = vmatpush.msra.mxu0 %v62_v8  ;;  %193 = vmatpush.msra.mxu2 %v96_v15  ;;  %v111_v24 = vld [vmem:[#allocation5 + $0x1e0] sm:$0xff]  ;;  %v74_v26 = vld [vmem:[#allocation5 + $0xb8] sm:$0xff]  ;;  %v57_v29 = vld [vmem:[#allocation5 + $0x30] sm:$0xff] }
  0x15   :  { %175 = vmatpush.msra.mxu1 %v78_v9  ;;  %213 = vmatpush.msra.mxu3 %v112_v20  ;;  %v110_v28 = vld [vmem:[#allocation5 + $0x1d8] sm:$0xff]  ;;  %v73_v30 = vld [vmem:[#allocation5 + $0xb0] sm:$0xff]  ;;  %v92_v31 = vld [vmem:[#allocation5 + $0x148] sm:$0xff] }
  0x16   :  { %156 = vmatpush.msra.mxu0 %v61_v10  ;;  %194 = vmatpush.msra.mxu2 %v95_v19  ;;  %v109_v32 = vld [vmem:[#allocation5 + $0x1d0] sm:$0xff]  ;;  %v56_v33 = vld [vmem:[#allocation5 + $0x28] sm:$0xff]  ;;  %v91_v35 = vld [vmem:[#allocation5 + $0x140] sm:$0xff] }
  0x17   :  { %176 = vmatpush.msra.mxu1 %v77_v12  ;;  %214 = vmatpush.msra.mxu3 %v111_v24  ;;  %v72_v34 = vld [vmem:[#allocation5 + $0xa8] sm:$0xff]  ;;  %v55_v37 = vld [vmem:[#allocation5 + $0x20] sm:$0xff]  ;;  %v90_v39 = vld [vmem:[#allocation5 + $0x138] sm:$0xff] }
  0x18   :  { %157 = vmatpush.msra.mxu0 %v60_v17  ;;  %195 = vmatpush.msra.mxu2 %v94_v23  ;;  %v108_v36 = vld [vmem:[#allocation5 + $0x1c8] sm:$0xff]  ;;  %v71_v38 = vld [vmem:[#allocation5 + $0xa0] sm:$0xff]  ;;  %v54_v41 = vld [vmem:[#allocation5 + $0x18] sm:$0xff] }
  0x19   :  { %177 = vmatpush.msra.mxu1 %v76_v18  ;;  %215 = vmatpush.msra.mxu3 %v110_v28  ;;  %v107_v40 = vld [vmem:[#allocation5 + $0x1c0] sm:$0xff]  ;;  %v70_v42 = vld [vmem:[#allocation5 + $0x98] sm:$0xff]  ;;  %v89_v43 = vld [vmem:[#allocation5 + $0x130] sm:$0xff] }
  0x1a   :  { %158 = vmatpush.msra.mxu0 %v59_v21  ;;  %196 = vmatpush.msra.mxu2 %v93_v27  ;;  %v106_v44 = vld [vmem:[#allocation5 + $0x1b8] sm:$0xff]  ;;  %v53_v45 = vld [vmem:[#allocation5 + $0x10] sm:$0xff]  ;;  %v88_v47 = vld [vmem:[#allocation5 + $0x128] sm:$0xff] }
  0x1b   :  { %178 = vmatpush.msra.mxu1 %v75_v22  ;;  %216 = vmatpush.msra.mxu3 %v109_v32  ;;  %v69_v46 = vld [vmem:[#allocation5 + $0x90] sm:$0xff]  ;;  %v52_v49 = vld [vmem:[#allocation5 + $0x8] sm:$0xff]  ;;  %v87_v51 = vld [vmem:[#allocation5 + $0x120] sm:$0xff] }
  0x1c   :  { %159 = vmatpush.msra.mxu0 %v58_v25  ;;  %197 = vmatpush.msra.mxu2 %v92_v31  ;;  %v105_v48 = vld [vmem:[#allocation5 + $0x1b0] sm:$0xff]  ;;  %v68_v50 = vld [vmem:[#allocation5 + $0x88] sm:$0xff]  ;;  %v51_v53 = vld [vmem:[#allocation5] sm:$0xff] }
  0x1d   :  { %179 = vmatpush.msra.mxu1 %v74_v26  ;;  %217 = vmatpush.msra.mxu3 %v108_v36  ;;  %v104_v52 = vld [vmem:[#allocation5 + $0x1a8] sm:$0xff]  ;;  %v67_v54 = vld [vmem:[#allocation5 + $0x80] sm:$0xff]  ;;  %v130_v55 = vld [vmem:[#allocation5 + $0x278] sm:$0xff] }
  0x1e   :  { %160 = vmatpush.msra.mxu0 %v57_v29  ;;  %198 = vmatpush.msra.mxu2 %v91_v35  ;;  %v146_v56 = vld [vmem:[#allocation5 + $0x2f8] sm:$0xff]  ;;  %v103_v58 = vld [vmem:[#allocation5 + $0x1a0] sm:$0xff]  ;;  %v129_v59 = vld [vmem:[#allocation5 + $0x270] sm:$0xff] }
  0x1f   :  { %180 = vmatpush.msra.mxu1 %v73_v30  ;;  %218 = vmatpush.msra.mxu3 %v107_v40  ;;  %v86_v57 = vld [vmem:[#allocation5 + $0x118] sm:$0xff]  ;;  %v145_v60 = vld [vmem:[#allocation5 + $0x2f0] sm:$0xff]  ;;  %v128_v63 = vld [vmem:[#allocation5 + $0x268] sm:$0xff] }
  0x20   :  { %161 = vmatpush.msra.mxu0 %v56_v33  ;;  %199 = vmatpush.msra.mxu2 %v90_v39  ;;  %v85_v61 = vld [vmem:[#allocation5 + $0x110] sm:$0xff]  ;;  %v102_v62 = vld [vmem:[#allocation5 + $0x198] sm:$0xff]  ;;  %v144_v0 = vld [vmem:[#allocation5 + $0x2e8] sm:$0xff] }
  0x21   :  { %181 = vmatpush.msra.mxu1 %v72_v34  ;;  %219 = vmatpush.msra.mxu3 %v106_v44  ;;  %v84_v1 = vld [vmem:[#allocation5 + $0x108] sm:$0xff]  ;;  %v101_v2 = vld [vmem:[#allocation5 + $0x190] sm:$0xff]  ;;  %v127_v3 = vld [vmem:[#allocation5 + $0x260] sm:$0xff] }
  0x22   :  { %162 = vmatpush.msra.mxu0 %v55_v37  ;;  %200 = vmatpush.msra.mxu2 %v89_v43  ;;  %v143_v4 = vld [vmem:[#allocation5 + $0x2e0] sm:$0xff]  ;;  %v100_v6 = vld [vmem:[#allocation5 + $0x188] sm:$0xff]  ;;  %v126_v7 = vld [vmem:[#allocation5 + $0x258] sm:$0xff] }
  0x23   :  { %182 = vmatpush.msra.mxu1 %v71_v38  ;;  %220 = vmatpush.msra.mxu3 %v105_v48  ;;  %v83_v5 = vld [vmem:[#allocation5 + $0x100] sm:$0xff]  ;;  %v142_v8 = vld [vmem:[#allocation5 + $0x2d8] sm:$0xff]  ;;  %v125_v11 = vld [vmem:[#allocation5 + $0x250] sm:$0xff] }
  0x24   :  { %163 = vmatpush.msra.mxu0 %v54_v41  ;;  %201 = vmatpush.msra.mxu2 %v88_v47  ;;  %v47_v9 = vld [vmem:[#allocation2 + $0x10] sm:$0xff]  ;;  %v141_v12 = vld [vmem:[#allocation5 + $0x2d0] sm:$0xff]  ;;  %v48_v14 = vld [vmem:[#allocation2 + $0x18] sm:$0xff] }
  0x25   :  { %183 = vmatpush.msra.mxu1 %v70_v42  ;;  %221 = vmatpush.msra.mxu3 %v104_v52  ;;  %v99_v10 = vld [vmem:[#allocation5 + $0x180] sm:$0xff]  ;;  %v45_v13 = vld [vmem:[#allocation2] sm:$0xff]  ;;  %v124_v15 = vld [vmem:[#allocation5 + $0x248] sm:$0xff] }
  0x26   :  { %164 = vmatpush.msra.mxu0 %v53_v45  ;;  %202 = vmatpush.msra.mxu2 %v87_v51  ;;  %v140_v16 = vld [vmem:[#allocation5 + $0x2c8] sm:$0xff]  ;;  %v46_v17 = vld [vmem:[#allocation2 + $0x8] sm:$0xff]  ;;  %v123_v18 = vld [vmem:[#allocation5 + $0x240] sm:$0xff] }
  0x27   :  { %184 = vmatpush.msra.mxu1 %v69_v46  ;;  %222 = vmatpush.msra.mxu3 %v103_v58  ;;  %v139_v19 = vld [vmem:[#allocation5 + $0x2c0] sm:$0xff]  ;;  %v122_v20 = vld [vmem:[#allocation5 + $0x238] sm:$0xff]  ;;  %v121_v22 = vld [vmem:[#allocation5 + $0x230] sm:$0xff] }
  0x28   :  { %165 = vmatpush.msra.mxu0 %v52_v49  ;;  %203 = vmatpush.msra.mxu2 %v86_v57  ;;  %v138_v21 = vld [vmem:[#allocation5 + $0x2b8] sm:$0xff]  ;;  %v137_v23 = vld [vmem:[#allocation5 + $0x2b0] sm:$0xff]  ;;  %v120_v24 = vld [vmem:[#allocation5 + $0x228] sm:$0xff] }
  0x29   :  { %185 = vmatpush.msra.mxu1 %v68_v50  ;;  %223 = vmatpush.msra.mxu3 %v102_v62  ;;  %v136_v25 = vld [vmem:[#allocation5 + $0x2a8] sm:$0xff]  ;;  %v119_v26 = vld [vmem:[#allocation5 + $0x220] sm:$0xff]  ;;  %v118_v28 = vld [vmem:[#allocation5 + $0x218] sm:$0xff] }
  0x2a   :  { %166 = vmatpush.msra.mxu0 %v51_v53  ;;  %204 = vmatpush.msra.mxu2 %v85_v61  ;;  %v135_v27 = vld [vmem:[#allocation5 + $0x2a0] sm:$0xff]  ;;  %v134_v29 = vld [vmem:[#allocation5 + $0x298] sm:$0xff]  ;;  %v117_v30 = vld [vmem:[#allocation5 + $0x210] sm:$0xff] }
  0x2b   :  { %186 = vmatpush.msra.mxu1 %v67_v54  ;;  %224 = vmatpush.msra.mxu3 %v101_v2  ;;  %v133_v31 = vld [vmem:[#allocation5 + $0x290] sm:$0xff]  ;;  %v116_v32 = vld [vmem:[#allocation5 + $0x208] sm:$0xff]  ;;  %v115_v34 = vld [vmem:[#allocation5 + $0x200] sm:$0xff] }
  0x2c   :  { %231 = vmatpush.msrb.mxu0 %v130_v55  ;;  %205 = vmatpush.msra.mxu2 %v84_v1  ;;  %v132_v33 = vld [vmem:[#allocation5 + $0x288] sm:$0xff]  ;;  %v131_v35 = vld [vmem:[#allocation5 + $0x280] sm:$0xff]  ;;  %v49_v36 = vld [vmem:[#allocation2 + $0x20] sm:$0xff] }
  0x2d   :  { %251 = vmatpush.msrb.mxu1 %v146_v56  ;;  %225 = vmatpush.msra.mxu3 %v100_v6  ;;  %v50_v37 = vld [vmem:[#allocation2 + $0x28] sm:$0xff]  ;;  %v295_v38 = vld [vmem:[%s413_s2] ss:$0 sm:$0xff] }
  0x2e   :  { %232 = vmatpush.msrb.mxu0 %v129_v59  ;;  %206 = vmatpush.msra.mxu2 %v83_v5 }
  0x2f   :  { %252 = vmatpush.msrb.mxu1 %v145_v60  ;;  %207 = vmatmul.f32.vlgmr.msra.gmra.mxu2 %v47_v9 }
  0x30   :  { %233 = vmatpush.msrb.mxu0 %v128_v63  ;;  %226 = vmatpush.msra.mxu3 %v99_v10 }
  0x31   :  { %253 = vmatpush.msrb.mxu1 %v144_v0  ;;  %167 = vmatmul.f32.vlgmr.msra.gmra.mxu0 %v45_v13 }
  0x32   :  { %234 = vmatpush.msrb.mxu0 %v127_v3  ;;  %227 = vmatmul.f32.vlgmr.msra.gmra.mxu3 %v48_v14 }
  0x33   :  { %254 = vmatpush.msrb.mxu1 %v143_v4 }
  0x34   :  { %235 = vmatpush.msrb.mxu0 %v126_v7  ;;  %187 = vmatmul.f32.vlgmr.msra.gmra.mxu1 %v46_v17 }
  0x35   :  { %255 = vmatpush.msrb.mxu1 %v142_v8 }
  0x36   :  { %236 = vmatpush.msrb.mxu0 %v125_v11 }
  0x37   :  { %256 = vmatpush.msrb.mxu1 %v141_v12 }
  0x38   :  { %237 = vmatpush.msrb.mxu0 %v124_v15 }
  0x39   :  { %257 = vmatpush.msrb.mxu1 %v140_v16 }
  0x3a   :  { %238 = vmatpush.msrb.mxu0 %v123_v18 }
  0x3b   :  { %258 = vmatpush.msrb.mxu1 %v139_v19 }
  0x3c   :  { %239 = vmatpush.msrb.mxu0 %v122_v20 }
  0x3d   :  { %259 = vmatpush.msrb.mxu1 %v138_v21 }
  0x3e   :  { %240 = vmatpush.msrb.mxu0 %v121_v22 }
  0x3f   :  { %260 = vmatpush.msrb.mxu1 %v137_v23 }
  0x40   :  { %241 = vmatpush.msrb.mxu0 %v120_v24 }
  0x41   :  { %261 = vmatpush.msrb.mxu1 %v136_v25 }
  0x42   :  { %242 = vmatpush.msrb.mxu0 %v119_v26 }
  0x43   :  { %262 = vmatpush.msrb.mxu1 %v135_v27 }
  0x44   :  { %243 = vmatpush.msrb.mxu0 %v118_v28 }
  0x45   :  { %263 = vmatpush.msrb.mxu1 %v134_v29 }
  0x46   :  { %244 = vmatpush.msrb.mxu0 %v117_v30 }
  0x47   :  { %264 = vmatpush.msrb.mxu1 %v133_v31 }
  0x48   :  { %245 = vmatpush.msrb.mxu0 %v116_v32 }
  0x49   :  { %265 = vmatpush.msrb.mxu1 %v132_v33 }
  0x4a   :  { %246 = vmatpush.msrb.mxu0 %v115_v34 }
  0x4b   :  { %266 = vmatpush.msrb.mxu1 %v131_v35  ;;  %247 = vmatmul.f32.vlgmr.msrb.gmra.mxu0 %v49_v36 }
  0x4c   :  { %267 = vmatmul.f32.vlgmr.msrb.gmra.mxu1 %v50_v37 }
  0xae   :  { %v168_v39 = vpop.f32.mrf.mxu0 }
  0xaf   :  { %v169_v40 = vadd.f32 %v295_v38, %v168_v39 }
  0xb1   :  { %v188_v41 = vpop.f32.mrf.mxu1 }
  0xb2   :  { %v189_v42 = vadd.f32 %v188_v41, %v169_v40  ;;  %v208_v43 = vpop.f32.mrf.mxu2 }
  0xb4   :  { %v209_v44 = vadd.f32 %v208_v43, %v189_v42 }
  0xb5   :  { %v228_v45 = vpop.f32.mrf.mxu3 }
  0xb6   :  { %v229_v46 = vadd.f32 %v228_v45, %v209_v44 }
  0xc8   :  { %v248_v47 = vpop.f32.mrf.mxu0 }
  0xc9   :  { %v268_v48 = vpop.f32.mrf.mxu1  ;;  %v249_v49 = vadd.f32 %v248_v47, %v229_v46 }
  0xcb   :  { %v269_v50 = vadd.f32 %v268_v48, %v249_v49 }
  0xcd   :  { %271 = vst [vmem:[#allocation7] sm:$0xff] %v269_v50 }
  0xce   :  { %282 = dma.vmem_to_hbm [thread:$0]  %s278_s25, 128, %s280_s28, [#allocation4]  }
  0xcf   :  { %372 = dma.done.wait [#allocation4], 128  }
  0xd0   :  { %373 = vsyncadd [#allocation4], 4294967168 }
  0xd1   :  { %287 = vsyncpa [#allocation3], 1 }
  0xd2   :  { %288 = vsyncpa [#allocation6], 1 }
  0xd3   :  { %289 = vsyncpa [#allocation4], 1 }

</bundles_post_ra>
